<compile_context>
chip_gen: v7x
topology: tpu7x:2x2x1
jax: 0.10.0
libtpu: 0.0.40
codegen_flags: <defaults>
</compile_context>

<pallas_src>
import functools
import math

import jax
import jax.numpy as jnp
from jax.experimental import pallas as pl
from jax.experimental.pallas import tpu as pltpu


def _round_up(x, m):
    return ((x + m - 1) // m) * m


def _choose_lane_tiling(hw, c, itemsize,
                        target_bytes=2 * 1024 * 1024, max_lanes=2048):
    """Lane (HW) tiling: multiple of 128, ~target_bytes per (C, T) tile."""
    hw128 = _round_up(hw, 128)
    t = (target_bytes // max(1, c * itemsize)) // 128 * 128
    t = max(128, min(t, max_lanes, hw128))
    n_t = math.ceil(hw128 / t)
    t = _round_up(math.ceil(hw128 / n_t), 128)
    return t, n_t, t * n_t


def _choose_row_tiling(rows, lane_tile, itemsize,
                       target_bytes=2 * 1024 * 1024):
    """Row (B*C) tiling for the scale pass: full rows or a multiple of 8."""
    tr_target = max(8, (target_bytes // max(1, lane_tile * itemsize)) // 8 * 8)
    if rows <= tr_target:
        return rows, 1, rows
    r_pad = _round_up(rows, 8)
    n_r = math.ceil(r_pad / tr_target)
    tr = _round_up(math.ceil(r_pad / n_r), 8)
    return tr, n_r, tr * n_r


def _pool_gate_kernel(x_ref, w1_ref, w2_ref, gate_ref, m_sc, s_sc,
                      *, hw, lane_tile, needs_mask):
    # x_ref:    (1, C, lane_tile) current image / current HW tile (native dtype)
    # w1_ref:   (C_r, C)  fc1 weight, PyTorch Linear layout, f32
    # w2_ref:   (C, C_r)  fc2 weight, PyTorch Linear layout, f32
    # gate_ref: (1, C, 1) per-channel sigmoid gate (f32), written on last tile
    # m_sc/s_sc:(C, 1)    f32 running max / running sum across HW tiles
    t = pl.program_id(1)

    @pl.when(t == 0)
    def _init():
        m_sc[...] = jnp.full_like(m_sc, -jnp.inf)
        s_sc[...] = jnp.zeros_like(s_sc)

    x = x_ref[0].astype(jnp.float32)                        # (C, T)
    if needs_mask:
        pos = t * lane_tile + jax.lax.broadcasted_iota(jnp.int32, x.shape, 1)
        valid = pos < hw
        x_max = jnp.where(valid, x, -jnp.inf)
        x_sum = jnp.where(valid, x, 0.0)
    else:
        x_max = x
        x_sum = x

    m_sc[...] = jnp.maximum(m_sc[...], jnp.max(x_max, axis=1, keepdims=True))
    s_sc[...] = s_sc[...] + jnp.sum(x_sum, axis=1, keepdims=True)

    # Tiny MLP: once per image, hoisted off the per-tile path.
    @pl.when(t == pl.num_programs(1) - 1)
    def _finalize():
        mx = m_sc[...]                                      # (C, 1)
        av = s_sc[...] * (1.0 / hw)                         # (C, 1), true H*W
        pooled = jnp.concatenate([mx, av], axis=1)          # (C, 2)
        # merged fc1: one dot covers both pooled vectors
        h = jnp.maximum(
            jnp.dot(w1_ref[...], pooled, preferred_element_type=jnp.float32),
            0.0)                                            # (C_r, 2)
        hsum = h[:, 0:1] + h[:, 1:2]                        # (C_r, 1)
        # merged fc2: logits = w2 @ (h_max + h_avg)
        logits = jnp.dot(w2_ref[...], hsum,
                         preferred_element_type=jnp.float32)  # (C, 1)
        gate_ref[0] = jax.nn.sigmoid(logits)


def _scale_kernel(x_ref, gate_ref, o_ref):
    # x_ref/o_ref: (row_tile, lane_tile) native dtype
    # gate_ref:    (row_tile, 1) f32 per-(b, c) gate, broadcast over lanes
    x = x_ref[...].astype(jnp.float32)
    o_ref[...] = (x * gate_ref[...]).astype(o_ref.dtype)


def channel_attention_pallas(inputs, w1, w2):
    """inputs: (B, C, H, W). w1: (C//r, C), w2: (C, C//r) (PyTorch Linear layout)."""
    b, c, h, w = inputs.shape
    hw = h * w
    in_dtype = inputs.dtype
    itemsize = jnp.dtype(in_dtype).itemsize

    c_r = w1.shape[0]
    w1f = jnp.asarray(w1, jnp.float32)                      # (C_r, C)
    w2f = jnp.asarray(w2, jnp.float32)                      # (C, C_r)

    lane_t, n_t, hw_pad = _choose_lane_tiling(hw, c, itemsize)
    x3 = inputs.reshape(b, c, hw)
    if hw_pad != hw:
        x3 = jnp.pad(x3, ((0, 0), (0, 0), (0, hw_pad - hw)))
    needs_mask = hw_pad != hw

    # ---- pass 1: pooled stats + gate MLP (one (C, 1) gate per image) ----
    gate = pl.pallas_call(
        functools.partial(_pool_gate_kernel, hw=hw, lane_tile=lane_t,
                          needs_mask=needs_mask),
        out_shape=jax.ShapeDtypeStruct((b, c, 1), jnp.float32),
        grid_spec=pltpu.PrefetchScalarGridSpec(
            num_scalar_prefetch=0,
            grid=(b, n_t),
            in_specs=[
                pl.BlockSpec((1, c, lane_t), lambda i, t: (i, 0, t)),
                pl.BlockSpec((c_r, c), lambda i, t: (0, 0)),
                pl.BlockSpec((c, c_r), lambda i, t: (0, 0)),
            ],
            out_specs=pl.BlockSpec((1, c, 1), lambda i, t: (i, 0, 0)),
            scratch_shapes=[pltpu.VMEM((c, 1), jnp.float32),
                            pltpu.VMEM((c, 1), jnp.float32)],
        ),
        compiler_params=pltpu.CompilerParams(
            dimension_semantics=("parallel", "arbitrary")),
    )(x3, w1f, w2f)

    # ---- pass 2: bandwidth-bound scale pass on (B*C, HW_pad) rows ----
    rows = b * c
    row_t, n_r, rows_pad = _choose_row_tiling(rows, lane_t, itemsize)
    x2 = x3.reshape(rows, hw_pad)
    g2 = gate.reshape(rows, 1)
    if rows_pad != rows:
        x2 = jnp.pad(x2, ((0, rows_pad - rows), (0, 0)))
        g2 = jnp.pad(g2, ((0, rows_pad - rows), (0, 0)))

    out2 = pl.pallas_call(
        _scale_kernel,
        out_shape=jax.ShapeDtypeStruct((rows_pad, hw_pad), in_dtype),
        grid_spec=pltpu.PrefetchScalarGridSpec(
            num_scalar_prefetch=0,
            grid=(n_r, n_t),
            in_specs=[
                pl.BlockSpec((row_t, lane_t), lambda r, t: (r, t)),
                pl.BlockSpec((row_t, 1), lambda r, t: (r, 0)),
            ],
            out_specs=pl.BlockSpec((row_t, lane_t), lambda r, t: (r, t)),
        ),
        compiler_params=pltpu.CompilerParams(
            dimension_semantics=("parallel", "parallel")),
    )(x2, g2)

    return out2[:rows, :hw].reshape(b, c, h, w)


def channel_attention_ref(inputs, w1, w2):
    """Pure-JAX reference matching the PyTorch forward."""
    max_pool = jnp.max(inputs, axis=(2, 3))                 # (B, C)
    avg_pool = jnp.mean(inputs, axis=(2, 3))                # (B, C)
    h_max = jax.nn.relu(max_pool @ w1.T)
    h_avg = jax.nn.relu(avg_pool @ w1.T)
    gate = jax.nn.sigmoid(h_max @ w2.T + h_avg @ w2.T)      # (B, C)
    return inputs * gate[:, :, None, None]


if __name__ == "__main__":
    key = jax.random.PRNGKey(0)
    k_x, k_w1, k_w2 = jax.random.split(key, 3)

    B, C, H, W = 2, 8, 16, 16
    RATIO = 4
    C_R = C // RATIO

    x = jax.random.normal(k_x, (B, C, H, W), dtype=jnp.float32)
    # PyTorch Linear layout: (out_features, in_features)
    w1 = jax.random.normal(k_w1, (C_R, C), dtype=jnp.float32) * 0.2
    w2 = jax.random.normal(k_w2, (C, C_R), dtype=jnp.float32) * 0.2

    out = channel_attention_pallas(x, w1, w2)
    out = jax.block_until_ready(out)

    ref = channel_attention_ref(x, w1, w2)
    assert out.shape == (B, C, H, W)
    assert out.dtype == x.dtype
    assert jnp.allclose(out, ref, atol=1e-5, rtol=1e-5), "mismatch vs reference"

    print("KERNEL_OK")
</pallas_src>

<mosaic_0001>
module attributes {stable_mosaic.version = 11 : i64} {
  func.func @_pool_gate_kernel(%arg0: i32, %arg1: i32, %arg2: memref<1x8x256xf32, #tpu.memory_space<vmem>>, %arg3: memref<2x8xf32, #tpu.memory_space<vmem>>, %arg4: memref<8x2xf32, #tpu.memory_space<vmem>>, %arg5: memref<1x8x1xf32, #tpu.memory_space<vmem>>, %arg6: memref<8x1xf32, #tpu.memory_space<vmem>>, %arg7: memref<8x1xf32, #tpu.memory_space<vmem>>) attributes {dimension_semantics = [#tpu.dimension_semantics<parallel>, #tpu.dimension_semantics<arbitrary>], iteration_bounds = array<i64: 2, 1>, scalar_prefetch = 0 : i64, scratch_operands = 2 : i64, tpu.core_type = #tpu.core_type<tc>, window_params = [{transform_indices = @transform_0, window_bounds = array<i64: 1, 8, 256>}, {pipeline_mode = #tpu.pipeline_mode<synchronous>, transform_indices = @transform_1, window_bounds = array<i64: 2, 8>}, {pipeline_mode = #tpu.pipeline_mode<synchronous>, transform_indices = @transform_2, window_bounds = array<i64: 8, 2>}, {transform_indices = @transform_3, window_bounds = array<i64: 1, 8, 1>}]} {
    %c0_i32 = arith.constant 0 : i32
    %0 = arith.cmpi eq, %arg1, %c0_i32 : i32
    %1 = arith.extui %0 : i1 to i32
    %c0_i32_0 = arith.constant 0 : i32
    %2 = arith.cmpi ne, %1, %c0_i32_0 : i32
    scf.if %2 {
      %cst_14 = arith.constant 0xFF800000 : f32
      %18 = vector.broadcast %cst_14 : f32 to vector<8x1xf32>
      %c0_15 = arith.constant 0 : index
      %c0_16 = arith.constant 0 : index
      %19 = vector.load %arg6[%c0_15, %c0_16] : memref<8x1xf32, #tpu.memory_space<vmem>>, vector<8x1xf32>
      tpu.vector_store %arg6[%c0_15, %c0_16], %18 {strides = array<i32>} : memref<8x1xf32, #tpu.memory_space<vmem>>, vector<8x1xf32>,
      %cst_17 = arith.constant 0.000000e+00 : f32
      %20 = vector.broadcast %cst_17 : f32 to vector<8x1xf32>
      %c0_18 = arith.constant 0 : index
      %c0_19 = arith.constant 0 : index
      %21 = vector.load %arg7[%c0_18, %c0_19] : memref<8x1xf32, #tpu.memory_space<vmem>>, vector<8x1xf32>
      tpu.vector_store %arg7[%c0_18, %c0_19], %20 {strides = array<i32>} : memref<8x1xf32, #tpu.memory_space<vmem>>, vector<8x1xf32>,
    } else {
    }
    %c0 = arith.constant 0 : index
    %c0_1 = arith.constant 0 : index
    %c0_2 = arith.constant 0 : index
    %3 = vector.load %arg2[%c0, %c0_1, %c0_2] : memref<1x8x256xf32, #tpu.memory_space<vmem>>, vector<1x8x256xf32>
    %4 = vector.shape_cast %3 : vector<1x8x256xf32> to vector<8x256xf32>
    %c0_3 = arith.constant 0 : index
    %c0_4 = arith.constant 0 : index
    %5 = vector.load %arg6[%c0_3, %c0_4] : memref<8x1xf32, #tpu.memory_space<vmem>>, vector<8x1xf32>
    %cst = arith.constant dense<0xFF800000> : vector<8xf32>
    %6 = vector.multi_reduction <maximumf>, %4, %cst [1] : vector<8x256xf32> to vector<8xf32>
    %7 = vector.shape_cast %6 : vector<8xf32> to vector<8x1xf32>
    %8 = arith.maximumf %5, %7 : vector<8x1xf32>
    %c0_5 = arith.constant 0 : index
    %c0_6 = arith.constant 0 : index
    %9 = vector.load %arg6[%c0_5, %c0_6] : memref<8x1xf32, #tpu.memory_space<vmem>>, vector<8x1xf32>
    tpu.vector_store %arg6[%c0_5, %c0_6], %8 {strides = array<i32>} : memref<8x1xf32, #tpu.memory_space<vmem>>, vector<8x1xf32>,
    %c0_7 = arith.constant 0 : index
    %c0_8 = arith.constant 0 : index
    %10 = vector.load %arg7[%c0_7, %c0_8] : memref<8x1xf32, #tpu.memory_space<vmem>>, vector<8x1xf32>
    %cst_9 = arith.constant dense<0.000000e+00> : vector<8xf32>
    %11 = vector.multi_reduction <add>, %4, %cst_9 [1] : vector<8x256xf32> to vector<8xf32>
    %12 = vector.shape_cast %11 : vector<8xf32> to vector<8x1xf32>
    %13 = arith.addf %10, %12 : vector<8x1xf32>
    %c0_10 = arith.constant 0 : index
    %c0_11 = arith.constant 0 : index
    %14 = vector.load %arg7[%c0_10, %c0_11] : memref<8x1xf32, #tpu.memory_space<vmem>>, vector<8x1xf32>
    tpu.vector_store %arg7[%c0_10, %c0_11], %13 {strides = array<i32>} : memref<8x1xf32, #tpu.memory_space<vmem>>, vector<8x1xf32>,
    %c0_i32_12 = arith.constant 0 : i32
    %15 = arith.cmpi eq, %arg1, %c0_i32_12 : i32
    %16 = arith.extui %15 : i1 to i32
    %c0_i32_13 = arith.constant 0 : i32
    %17 = arith.cmpi ne, %16, %c0_i32_13 : i32
    scf.if %17 {
      %c0_14 = arith.constant 0 : index
      %c0_15 = arith.constant 0 : index
      %18 = vector.load %arg6[%c0_14, %c0_15] : memref<8x1xf32, #tpu.memory_space<vmem>>, vector<8x1xf32>
      %c0_16 = arith.constant 0 : index
      %c0_17 = arith.constant 0 : index
      %19 = vector.load %arg7[%c0_16, %c0_17] : memref<8x1xf32, #tpu.memory_space<vmem>>, vector<8x1xf32>
      %cst_18 = arith.constant 3.906250e-03 : f32
      %20 = vector.broadcast %cst_18 : f32 to vector<8x1xf32>
      %21 = arith.mulf %19, %20 : vector<8x1xf32>
      %22 = tpu.concatenate %18, %21 in 1 : vector<8x1xf32>, vector<8x1xf32> -> vector<8x2xf32>
      %c0_19 = arith.constant 0 : index
      %c0_20 = arith.constant 0 : index
      %23 = vector.load %arg3[%c0_19, %c0_20] : memref<2x8xf32, #tpu.memory_space<vmem>>, vector<2x8xf32>
      %cst_21 = arith.constant dense<0.000000e+00> : vector<2x2xf32>
      %24 = tpu.matmul %23, %22, %cst_21 {dimension_numbers = #tpu.dot_dimension_numbers<[1], [0], [0], [1], [0, 0, 1, 1], [], []>} : vector<2x8xf32>, vector<8x2xf32>, vector<2x2xf32> -> vector<2x2xf32>
      %cst_22 = arith.constant 0.000000e+00 : f32
      %25 = vector.broadcast %cst_22 : f32 to vector<2x2xf32>
      %26 = arith.maximumf %24, %25 : vector<2x2xf32>
      %27 = vector.extract_strided_slice %26 {offsets = [0, 0], sizes = [2, 1], strides = [1, 1]} : vector<2x2xf32> to vector<2x1xf32>
      %28 = vector.extract_strided_slice %26 {offsets = [0, 1], sizes = [2, 1], strides = [1, 1]} : vector<2x2xf32> to vector<2x1xf32>
      %29 = arith.addf %27, %28 : vector<2x1xf32>
      %c0_23 = arith.constant 0 : index
      %c0_24 = arith.constant 0 : index
      %30 = vector.load %arg4[%c0_23, %c0_24] : memref<8x2xf32, #tpu.memory_space<vmem>>, vector<8x2xf32>
      %cst_25 = arith.constant dense<0.000000e+00> : vector<8x1xf32>
      %31 = tpu.matmul %30, %29, %cst_25 {dimension_numbers = #tpu.dot_dimension_numbers<[1], [0], [0], [1], [0, 0, 1, 1], [], []>} : vector<8x2xf32>, vector<2x1xf32>, vector<8x1xf32> -> vector<8x1xf32>
      %32 = arith.negf %31 : vector<8x1xf32>
      %33 = math.exp %32 : vector<8x1xf32>
      %cst_26 = arith.constant 1.000000e+00 : f32
      %34 = vector.broadcast %cst_26 : f32 to vector<8x1xf32>
      %35 = arith.addf %34, %33 : vector<8x1xf32>
      %36 = arith.divf %34, %35 : vector<8x1xf32>
      %c0_27 = arith.constant 0 : index
      %c0_28 = arith.constant 0 : index
      %c0_29 = arith.constant 0 : index
      %37 = vector.load %arg5[%c0_27, %c0_28, %c0_29] : memref<1x8x1xf32, #tpu.memory_space<vmem>>, vector<1x8x1xf32>
      %38 = vector.shape_cast %37 : vector<1x8x1xf32> to vector<8x1xf32>
      %39 = vector.shape_cast %36 : vector<8x1xf32> to vector<1x8x1xf32>
      tpu.vector_store %arg5[%c0_27, %c0_28, %c0_29], %39 {strides = array<i32>} : memref<1x8x1xf32, #tpu.memory_space<vmem>>, vector<1x8x1xf32>,
    } else {
    }
    return
  }
  func.func @transform_0(%arg0: i32, %arg1: i32) -> (i32, i32, i32) {
    %c0_i32 = arith.constant 0 : i32
    %c0_i32_0 = arith.constant 0 : i32
    return %arg0, %c0_i32, %arg1 : i32, i32, i32
  }
  func.func @transform_1(%arg0: i32, %arg1: i32) -> (i32, i32) {
    %c0_i32 = arith.constant 0 : i32
    %c0_i32_0 = arith.constant 0 : i32
    %c0_i32_1 = arith.constant 0 : i32
    return %c0_i32, %c0_i32_0 : i32, i32
  }
  func.func @transform_2(%arg0: i32, %arg1: i32) -> (i32, i32) {
    %c0_i32 = arith.constant 0 : i32
    %c0_i32_0 = arith.constant 0 : i32
    %c0_i32_1 = arith.constant 0 : i32
    return %c0_i32, %c0_i32_0 : i32, i32
  }
  func.func @transform_3(%arg0: i32, %arg1: i32) -> (i32, i32, i32) {
    %c0_i32 = arith.constant 0 : i32
    %c0_i32_0 = arith.constant 0 : i32
    %c0_i32_1 = arith.constant 0 : i32
    return %arg0, %c0_i32, %c0_i32_0 : i32, i32, i32
  }
}

</mosaic_0001>

<bundles_post_ra>
// kernel: tpu_custom_call.1
= control target key start
LH: loop header
LB: loop body
LE: loop exit
PB: predicated region body
PF: predicated region fallthrough
CT: control target
= control target key end

     0   :  { %8 = vsyncpa [#allocation5], 0  ;;  %s820_s0 = inlined_call_operand.hbm [shape: f32[2,8,256], index: 0, kind: input, shape index: {}]   ;;  %s821_s1 = inlined_call_operand.vmem [shape: f32[2,8], index: 1, kind: input, shape index: {}]   ;;  %s822_s2 = inlined_call_operand.vmem [shape: f32[8,2], index: 2, kind: input, shape index: {}]   ;;  %s823_s3 = inlined_call_operand.vmem [shape: f32[2,8,1], index: 3, kind: output, shape index: {}]  }
   0x1   :  { %10 = vsyncpa [#allocation5 + $0x1], 0  ;;  %s683_s12 = smov 0   ;;  %s685_s13 = smov 0  }
   0x2   :  { %s687_s14 = smov 0   ;;  %s689_s15 = smov 0  }
   0x3   :  { %s691_s16 = smov 0   ;;  %s693_s17 = smov 0  }
   0x4 LB: > { %s480_s18 = sadd.s32 4294967295, %s655_s17   ;;  %s28_s19 = sadd.s32 1, %s651_s16  ;;  %s655_s17 = sphi %s693_s17, %s16_s17   ;;  %s651_s16 = sphi %s691_s16, %s833_s16   ;;  %s647_s15 = sphi %s689_s15, %s832_s15   ;;  %s643_s14 = sphi %s687_s14, %s831_s14   ;;  %s639_s13 = sphi %s685_s13, %s830_s13   ;;  %s635_s12 = sphi %s683_s12, %s829_s12  }
   0x5   : > { %p30_p0 = scmp.ge.s32.totalorder %s28_s19, 2  ;;  %s37_s20 = sadd.s32 1, %s643_s14 }
   0x6   : > { %p44_p1 = scmp.ne.s32.totalorder %s643_s14, %s639_s13  ;;  %p45_p2 = scmp.eq.s32.totalorder %s655_s17, 0 }
   0x7   : > { %s835_s19 = smov (%p30_p0, %s28_s19), 0  ;;  %p50_p4 = scmp.ne.s32.totalorder %s639_s13, %s635_s12 }
   0x8   : > { %p719_p3 = por %p45_p2, %p44_p1  ;;  %s32_s22 = ssub.s32 %s651_s16, %s835_s19 }
   0x9   : > { %p51_p5 = scmp.eq.s32.totalorder %s480_s18, 0  ;;  %p35_p6 = scmp.eq.s32.totalorder %s32_s22, 0 }
   0xa   : > { %p517_p8 = scmp.lt.s32.totalorder %s655_s17, 2  ;;  %s148_s25 = sand.u32 1, %s643_s14  }
   0xb   : > { %p726_p7 = por %p51_p5, %p50_p4  ;;  %s496_s26 = sshll.u32 %s651_s16, 8 }
   0xc   : > { %s732_s24 = scalar_select %p35_p6, %s643_s14, %s37_s20  }
   0xd   : > { %s484_s27 = sshll.u32 %s148_s25, 4  ;;  %s739_s30 = scalar_lea.hbm %s820_s0, %s496_s26 }
   0xe   : > { %s152_s4 = scalar_lea.vmem [#allocation4], %s484_s27  ;;  %p743_p9 = pnand %p517_p8, %p719_p3 }
   0xf   : > { %s162_s5 = sshll.u32 %s152_s4, 4  ;;  %s149_s7 = scalar_lea.sflag [#allocation5], %s148_s25  ;;  %s747_s5 = int_to_ptr.vmem [resolvable:$true] %s162_s5 }
  0x10   : > { %s575_s8 = scalar_lea.hbm %s739_s30, 256  ;;  %p577_p13 = pneg %p743_p9 }
  0x11   : > { %p576_p12 = scmp.ne.s32.totalorder %s739_s30, %s575_s8  ;;  %s580_s11 = scalar_lea.hbm %s820_s0, 512 }
  0x12   : > { %p581_p2 = scmp.lt.u32.totalorder %s739_s30, %s820_s0  ;;  %p582_p3 = scmp.lt.u32.totalorder %s580_s11, %s575_s8 }
  0x13   : > { %p578_p0 = pnand %p577_p13, %p576_p12  ;;  %p584_p5 = scmp.lt.u32.totalorder %s575_s8, %s739_s30 }
  0x14   : > { %p583_p4 = por %p582_p3, %p581_p2 }
  0x15   : > { %p579_p1 = pneg %p578_p0 }
  0x16   : > { %p585_p6 = por %p584_p5, %p583_p4 }
  0x18   : > { %p586_p8 = pnand %p585_p6, %p579_p1 }
  0x1a   : > { %589 = shalt.err (!%p586_p8)
}
  0x1b   : > { %s590_s20 = scalar_lea.vmem %s747_s5, 256  ;;  %s657_s21 = smov [#allocation4]  }
  0x1c   : > { %p591_p12 = scmp.ne.s32.totalorder %s747_s5, %s590_s20  ;;  %s595_s22 = sshll.u32 %s657_s21, 4  ;;  %s596_s22 = int_to_ptr.vmem [resolvable:$false] %s595_s22 }
  0x1d   : > { %s597_s25 = scalar_lea.vmem %s596_s22, 512  ;;  %p598_p11 = scmp.lt.s32.totalorder %s747_s5, %s596_s22 }
  0x1e   : > { %p593_p0 = pnand %p591_p12, %p577_p13  ;;  %p599_p2 = scmp.lt.s32.totalorder %s597_s25, %s590_s20 }
  0x20   : > { %p594_p10 = pneg %p593_p0  ;;  %p600_p3 = por %p599_p2, %p598_p11 }
  0x22   : > { %p601_p4 = pnand %p600_p3, %p594_p10 }
  0x24   : > { %604 = shalt.err (!%p601_p4)
}
  0x25   : > { %516 = dma.hbm_to_vmem [thread:$0]  (!%p743_p9), %s739_s30, 256, %s747_s5, %s149_s7  }
  0x26   : > { %p827_p1 = scmp.lt.s32.totalorder %s655_s17, 3  ;;  %p828_p5 = scmp.ge.s32.totalorder %s655_s17, 1 }
  0x28   : > { %p168_p13 = pnand %p828_p5, %p827_p1 }
  0x29   : > { %s173_s26 = sand.u32 (!%p168_p13), 1, %s639_s13  }
  0x2a   : > { %171 = sbr.rel (%p168_p13) target bundleno = 895 (0x37f), region = 32  ;;  %s488_s27 = sshll.u32 (!%p168_p13), %s173_s26, 4 }
  0x2b   : > { %s174_s28 = scalar_lea.sflag (!%p168_p13), [#allocation5], %s173_s26  ;;  %s177_s29 = scalar_lea.vmem (!%p168_p13), [#allocation4], %s488_s27 }
  0x31   : > { %630 = dma.done.wait (%p726_p7), %s174_s28, 256  }
  0x32   : > { %632 = vsyncadd (%p726_p7), %s174_s28, 4294967040  ;;  %vm208_vm0 = vcmask 7168   ;;  %v658_v0 = vmov 0.0   ;;  %v211_v1 = vld [vmem:[%s177_s29] sm:$0xff]  ;;  %v212_v2 = vld [vmem:[%s177_s29 + $0x8] sm:$0xff]  ;;  %v659_v5 = vmov -inf  }
  0x33   : > { %210 = vst.msk [vmem:[#allocation3] sm:$0xff] %vm208_vm0, %v658_v0  ;;  %501 = vmatprep.subr.mxu0 %v658_v0  ;;  %506 = vmatprep.subr.mxu1 %v658_v0  ;;  %v221_v3 = vadd.f32 %v212_v2, %v211_v1  ;;  %v214_v4 = vmax.f32 %v211_v1, %v212_v2  ;;  %209 = vst.msk [vmem:[#allocation2] sm:$0xff] %vm208_vm0, %v659_v5  ;;  %vm660_vm1 = vmmov 0   ;;  %s661_s23 = smov 1   ;;  %v237_v16 = vld [vmem:[%s821_s1] sm:$0x3] }
  0x34   : > { %503 = vmatprep.mubr.msk.f32.mxu0 %vm660_vm1, %v658_v0  ;;  %508 = vmatprep.mubr.msk.f32.mxu1 %vm660_vm1, %v658_v0  ;;  %vm238_vm2 = vcmask 64512   ;;  %s662_s5 = smov 127   ;;  %vm323_vm3 = vcmask 1041408   ;;  %v318_v23 = vld [vmem:[%s822_s2] sm:$0xff]  ;;  %vm319_vm4 = vcmask 15360   ;;  %p200_p7 = scmp.lt.s32.totalorder %s647_s15, 1 }
  0x35   : > { %222 = vadd.xlane.f32.xlu0 %v221_v3 }
  0x36   : > { %s837_s15 = smov (!%p200_p7, %s647_s15), 1 }
  0x37   : > { %s489_s8 = sshll.u32 %s837_s15, 3 }
  0x38   : > { %s203_s11 = scalar_lea.vmem %s823_s3, %s489_s8 }
  0x39   : > { %215 = vmax.xlane.f32.xlu0 %v214_v4 }
  0x3a   : > { %v220_v6 = vld [vmem:[#allocation3] sm:$0xff]  ;;  %v213_v9 = vld [vmem:[#allocation2] sm:$0xff] }
  0xc2   : > { %v223_v7 = vpop.xlane.xlu0 %222 }
  0xc3   : > { %v224_v8 = vadd.f32 %v223_v7, %v220_v6 }
  0xc5   : > { %225 = vst.msk [vmem:[#allocation3] sm:$0xff] %vm208_vm0, %v224_v8 }
  0xc6   : > { %v216_v10 = vpop.xlane.xlu0 %215 }
  0xc7   : > { %v217_v11 = vmax.f32 %v213_v9, %v216_v10 }
  0xc9   : > { %219 = vst.msk [vmem:[#allocation2] sm:$0xff] %vm208_vm0, %v217_v11 }
  0xcc   : > { %v230_v12 = vld [vmem:[#allocation3] sm:$0xff] }
  0xcd   : > { %v231_v13 = vmul.f32 0.00390625, %v230_v12 }
  0xcf   : > { %233 = vrot.lane.b32.xlu1 %v231_v13, %s661_s23 }
  0xd0   : > { %v229_v14 = vld [vmem:[#allocation2] sm:$0xff] }
 0x141   : > { %v234_v15 = vpop.permute.xlu1 %233 }
 0x142   : > { %v236_v17 = vsel %vm208_vm0, %v229_v14, %v234_v15 }
 0x143   : > { %502 = vmatpush3.msra.mxu0 %v236_v17 }
 0x144   : > { %504 = vmatmul.mubr.msk.f32.vlgmr.msra.gmra.mrb[0].mxu0 %vm238_vm2, %v237_v16 }
 0x217   : > { %v308_v18 = vpop.f32.mrb[0].mxu0 }
 0x218   : > { %v312_v19 = vmax.f32 %v308_v18, 0.0  ;;  %v505_v20 = vpop.f32.mrb[1].mxu0 }
 0x21a   : > { %314 = vrot.lane.b32.xlu1 %v312_v19, %s662_s5 }
 0x28c   : > { %v315_v21 = vpop.permute.xlu1 %314 }
 0x28d   : > { %v317_v22 = vadd.f32 %v315_v21, %v312_v19 }
 0x28f   : > { %507 = vmatpush3.msk.msra.mxu1 %vm323_vm3, %v317_v22 }
 0x290   : > { %509 = vmatmul.mubr.msk.f32.vlgmr.msra.gmra.mrb[0].mxu1 %vm319_vm4, %v318_v23 }
 0x363   : > { %v393_v24 = vpop.f32.mrb[0].mxu1 }
 0x364   : > { %v493_v25 = vmul.f32 -1.442695, %v393_v24  ;;  %v510_v26 = vpop.f32.mrb[1].mxu1 }
 0x366   : > { %571 = vpow2.f32 %v493_v25 }
 0x370   : > { %v572_v27 = vpop.eup %571 }
 0x371   : > { %v400_v28 = vadd.f32 1.0, %v572_v27 }
 0x373   : > { %573 = vrcp.f32 %v400_v28 }
 0x37d   : > { %v574_v29 = vpop.eup %573 }
 0x37e   : > { %403 = vst.msk [vmem:[%s203_s11] sm:$0xff] %vm208_vm0, %v574_v29 }
 0x37f PF: > { %s16_s17 = sadd.s32 1, %s655_s17   ;;  %s829_s12 = smov %s639_s13 }
 0x380   : > { %p13_p9 = scmp.ge.s32.totalorder %s16_s17, 4   ;;  %s830_s13 = smov %s643_s14 }
 0x381   : > { %s831_s14 = smov %s732_s24  ;;  %s832_s15 = smov %s651_s16 }
 0x382   : > { %s833_s16 = smov %s835_s19  ;;  %15 = sbr.rel (!%p13_p9) target bundleno = 4 (0x4), region = 80 }
 0x389   :  { %423 = vsyncpa [#allocation5], 1 }
 0x38a   :  { %425 = vsyncpa [#allocation5 + $0x1], 1 }

</bundles_post_ra>
